<compile_context>
chip_gen: v5e
topology: v5e:2x2
jax: 0.10.0
libtpu: 0.0.40
codegen_flags: <defaults>
</compile_context>

<pallas_src>
import functools

import jax
import jax.numpy as jnp
import numpy as np
from jax import lax
from jax.experimental import pallas as pl
from jax.experimental.pallas import tpu as pltpu


def rcnn_kernel(x_ref, w12_ref, b12_ref, w3_ref, b3_ref, o_ref, *, C2, C3, H4):
    # x_ref block: (bb, H*D) -- one sample per sublane row, lane-dense.
    x = x_ref[...]

    # ---- fused conv1∘conv2 as ONE block-banded matmul -> (bb, H1*C2) ----
    q = jnp.dot(x, w12_ref[...], preferred_element_type=jnp.float32) + b12_ref[...]
    n1 = q.shape[-1]

    # ---- maxpool (2,1): valid pooled row j sits at lane-block 2*j ----
    # (odd blocks hold junk; the conv3 banded weight has zero rows there)
    p1 = jnp.maximum(q[:, :n1 - C2], q[:, C2:])                       # (bb, (H1-1)*C2)

    # ---- conv3 as ONE block-banded matmul on the pooled value -> (bb, H3*C3) ----
    c3 = jnp.dot(p1, w3_ref[...], preferred_element_type=jnp.float32) + b3_ref[...]

    # ---- maxpool (2,1) + lane compaction (H4 is tiny and static) ----
    outs = [jnp.maximum(c3[:, (2 * m) * C3:(2 * m + 1) * C3],
                        c3[:, (2 * m + 1) * C3:(2 * m + 2) * C3])
            for m in range(H4)]
    o_ref[...] = jnp.concatenate(outs, axis=-1)                        # (bb, H4*C3)


def _round_up(x, m):
    return (x + m - 1) // m * m


def rcnn_forward(x_nchw, params, *, block_batch=256):
    """x_nchw: (N, 1, H, D) float32 -> (N, 32, H_out, 1) float32 (same as PyTorch)."""
    w1, b1, w2, b2, w3, b3 = params
    N, cin, H, W = x_nchw.shape
    C1, _, _, D = w1.shape          # (16, 1, 1, D)
    C2 = w2.shape[0]                # 32
    C3 = w3.shape[0]                # 32
    assert cin == 1
    assert W == D, "RCNN Pallas kernel only supports W == D (conv1 collapses width)."

    H1 = H - 2
    H2 = H1 // 2
    H3 = H2 - 2
    H4 = H3 // 2
    assert H4 >= 1, "input height too small for the RCNN conv/pool stack"

    f32 = jnp.float32
    hi = lax.Precision.HIGHEST

    # conv1 as (D, C1); conv2 / conv3 per-tap stacks (Kh, Cin, Cout).
    w1m = jnp.transpose(w1[:, 0, 0, :], (1, 0)).astype(f32)            # (D, C1)
    w2t = jnp.transpose(w2[:, :, :, 0], (2, 1, 0)).astype(f32)         # (3, C1, C2)
    w3t = jnp.transpose(w3[:, :, :, 0], (2, 1, 0)).astype(f32)         # (3, C2, C3)

    # Algebraic conv1 -> conv2 fusion (both linear): W12[t] = W1 @ W2[t].
    w12 = jnp.einsum('dc,tce->tde', w1m, w2t, precision=hi)            # (3, D, C2)
    b12 = jnp.einsum('c,tce->e', b1.astype(f32), w2t, precision=hi) + b2.astype(f32)

    # Block-banded "big" weights so each conv is one lane-dense matmul.
    K1, N1 = H * D, H1 * C2
    w12cat = jnp.concatenate([w12[0], w12[1], w12[2]], axis=0)         # (3*D, C2)
    wbig12 = jnp.zeros((K1, N1), f32)
    for h in range(H1):
        wbig12 = wbig12.at[h * D:(h + 3) * D, h * C2:(h + 1) * C2].set(w12cat)
    b12big = jnp.tile(b12, H1)[None, :]                                # (1, N1)

    K2, N2 = (H1 - 1) * C2, H3 * C3
    wbig3 = jnp.zeros((K2, N2), f32)
    for i in range(H3):
        for t in range(3):
            r0 = 2 * (i + t) * C2                                      # pooled row i+t lives at lane-block 2*(i+t)
            wbig3 = wbig3.at[r0:r0 + C2, i * C3:(i + 1) * C3].set(w3t[t])
    b3big = jnp.tile(b3.astype(f32), H3)[None, :]                      # (1, N2)

    # Lane-dense input: one sample per row; plain (bitcast) reshape, no pad copy.
    x2d = x_nchw[:, 0].reshape(N, K1).astype(f32)

    # Batch tile: multiple of 8; cap at ~N/2 so grid >= 2 (both v7x TCs busy).
    bb = max(8, min(_round_up(block_batch, 8), _round_up(pl.cdiv(N, 2), 8)))
    grid = pl.cdiv(N, bb)   # partial last block: OOB rows are masked by Pallas.

    kernel = functools.partial(rcnn_kernel, C2=C2, C3=C3, H4=H4)

    out2d = pl.pallas_call(
        kernel,
        out_shape=jax.ShapeDtypeStruct((N, H4 * C3), jnp.float32),
        grid_spec=pltpu.PrefetchScalarGridSpec(
            num_scalar_prefetch=0,
            grid=(grid,),
            in_specs=[
                pl.BlockSpec((bb, K1), lambda i: (i, 0)),
                pl.BlockSpec((K1, N1), lambda i: (0, 0)),
                pl.BlockSpec((1, N1), lambda i: (0, 0)),
                pl.BlockSpec((K2, N2), lambda i: (0, 0)),
                pl.BlockSpec((1, N2), lambda i: (0, 0)),
            ],
            out_specs=pl.BlockSpec((bb, H4 * C3), lambda i: (i, 0)),
        ),
        compiler_params=pltpu.CompilerParams(
            dimension_semantics=("parallel",)),
    )(x2d, wbig12, b12big, wbig3, b3big)

    # (N, H4*C3) -> NCHW (N, C3, H4, 1), matching the PyTorch module.
    out = out2d.reshape(N, H4, C3)
    return jnp.transpose(out, (0, 2, 1))[..., None]


def rcnn_reference(x, params):
    """Pure-JAX reference matching the PyTorch RCNN forward (NCHW)."""
    w1, b1, w2, b2, w3, b3 = params

    def conv(y, w, b):
        dn = lax.conv_dimension_numbers(y.shape, w.shape, ("NCHW", "OIHW", "NCHW"))
        return lax.conv_general_dilated(
            y, w, (1, 1), "VALID", dimension_numbers=dn,
            precision=lax.Precision.HIGHEST) + b[None, :, None, None]

    def maxpool_h2(y):
        return lax.reduce_window(y, -jnp.inf, lax.max,
                                 (1, 1, 2, 1), (1, 1, 2, 1), "VALID")

    y = conv(x, w1, b1)
    y = conv(y, w2, b2)
    y = maxpool_h2(y)
    y = conv(y, w3, b3)
    y = maxpool_h2(y)
    return y


if __name__ == "__main__":
    N, H, D = 20, 16, 8

    key = jax.random.PRNGKey(0)
    ks = jax.random.split(key, 7)

    def uni(k, shape, fan_in):
        bound = 1.0 / np.sqrt(fan_in)
        return jax.random.uniform(k, shape, jnp.float32, -bound, bound)

    # Parameter shapes follow nn.Conv2d (OIHW) from the module's __init__.
    w1 = uni(ks[0], (16, 1, 1, D), 1 * 1 * D)
    b1 = uni(ks[1], (16,), 1 * 1 * D)
    w2 = uni(ks[2], (32, 16, 3, 1), 16 * 3 * 1)
    b2 = uni(ks[3], (32,), 16 * 3 * 1)
    w3 = uni(ks[4], (32, 32, 3, 1), 32 * 3 * 1)
    b3 = uni(ks[5], (32,), 32 * 3 * 1)
    params = (w1, b1, w2, b2, w3, b3)

    x = jax.random.normal(ks[6], (N, 1, H, D), jnp.float32)

    H4 = ((H - 2) // 2 - 2) // 2
    ref = rcnn_reference(x, params)

    # Default path: bb capped at ~N/2 -> 2 grid steps.
    out = jax.block_until_ready(rcnn_forward(x, params))
    assert out.shape == ref.shape == (N, 32, H4, 1), (out.shape, ref.shape)
    np.testing.assert_allclose(np.asarray(out), np.asarray(ref), rtol=1e-3, atol=1e-3)

    # Small-tile path: bb=8 -> 3 grid steps with a partial (masked) last block.
    out2 = jax.block_until_ready(rcnn_forward(x, params, block_batch=8))
    np.testing.assert_allclose(np.asarray(out2), np.asarray(ref), rtol=1e-3, atol=1e-3)

    print("KERNEL_OK")
</pallas_src>

<mosaic_0001>
module attributes {stable_mosaic.version = 11 : i64} {
  func.func @rcnn_kernel(%arg0: i32, %arg1: memref<16x128xf32, #tpu.memory_space<vmem>>, %arg2: memref<128x448xf32, #tpu.memory_space<vmem>>, %arg3: memref<1x448xf32, #tpu.memory_space<vmem>>, %arg4: memref<416x160xf32, #tpu.memory_space<vmem>>, %arg5: memref<1x160xf32, #tpu.memory_space<vmem>>, %arg6: memref<16x64xf32, #tpu.memory_space<vmem>>) attributes {dimension_semantics = [#tpu.dimension_semantics<parallel>], iteration_bounds = array<i64: 2>, scalar_prefetch = 0 : i64, scratch_operands = 0 : i64, tpu.core_type = #tpu.core_type<tc>, window_params = [{transform_indices = @transform_0, window_bounds = array<i64: 16, 128>}, {pipeline_mode = #tpu.pipeline_mode<synchronous>, transform_indices = @transform_1, window_bounds = array<i64: 128, 448>}, {pipeline_mode = #tpu.pipeline_mode<synchronous>, transform_indices = @transform_2, window_bounds = array<i64: 1, 448>}, {pipeline_mode = #tpu.pipeline_mode<synchronous>, transform_indices = @transform_3, window_bounds = array<i64: 416, 160>}, {pipeline_mode = #tpu.pipeline_mode<synchronous>, transform_indices = @transform_4, window_bounds = array<i64: 1, 160>}, {transform_indices = @transform_5, window_bounds = array<i64: 16, 64>}]} {
    %c0 = arith.constant 0 : index
    %c0_0 = arith.constant 0 : index
    %0 = vector.load %arg1[%c0, %c0_0] : memref<16x128xf32, #tpu.memory_space<vmem>>, vector<16x128xf32>
    %c0_1 = arith.constant 0 : index
    %c0_2 = arith.constant 0 : index
    %1 = vector.load %arg2[%c0_1, %c0_2] : memref<128x448xf32, #tpu.memory_space<vmem>>, vector<128x448xf32>
    %cst = arith.constant dense<0.000000e+00> : vector<16x448xf32>
    %2 = tpu.matmul %0, %1, %cst {dimension_numbers = #tpu.dot_dimension_numbers<[1], [0], [0], [1], [0, 0, 1, 1], [], []>} : vector<16x128xf32>, vector<128x448xf32>, vector<16x448xf32> -> vector<16x448xf32>
    %c0_3 = arith.constant 0 : index
    %c0_4 = arith.constant 0 : index
    %3 = vector.load %arg3[%c0_3, %c0_4] : memref<1x448xf32, #tpu.memory_space<vmem>>, vector<1x448xf32>
    %4 = vector.broadcast %3 : vector<1x448xf32> to vector<16x448xf32>
    %5 = arith.addf %2, %4 : vector<16x448xf32>
    %6 = vector.extract_strided_slice %5 {offsets = [0, 0], sizes = [16, 416], strides = [1, 1]} : vector<16x448xf32> to vector<16x416xf32>
    %7 = vector.extract_strided_slice %5 {offsets = [0, 32], sizes = [16, 416], strides = [1, 1]} : vector<16x448xf32> to vector<16x416xf32>
    %8 = arith.maximumf %6, %7 : vector<16x416xf32>
    %c0_5 = arith.constant 0 : index
    %c0_6 = arith.constant 0 : index
    %9 = vector.load %arg4[%c0_5, %c0_6] : memref<416x160xf32, #tpu.memory_space<vmem>>, vector<416x160xf32>
    %cst_7 = arith.constant dense<0.000000e+00> : vector<16x160xf32>
    %10 = tpu.matmul %8, %9, %cst_7 {dimension_numbers = #tpu.dot_dimension_numbers<[1], [0], [0], [1], [0, 0, 1, 1], [], []>} : vector<16x416xf32>, vector<416x160xf32>, vector<16x160xf32> -> vector<16x160xf32>
    %c0_8 = arith.constant 0 : index
    %c0_9 = arith.constant 0 : index
    %11 = vector.load %arg5[%c0_8, %c0_9] : memref<1x160xf32, #tpu.memory_space<vmem>>, vector<1x160xf32>
    %12 = vector.broadcast %11 : vector<1x160xf32> to vector<16x160xf32>
    %13 = arith.addf %10, %12 : vector<16x160xf32>
    %14 = vector.extract_strided_slice %13 {offsets = [0, 0], sizes = [16, 32], strides = [1, 1]} : vector<16x160xf32> to vector<16x32xf32>
    %15 = vector.extract_strided_slice %13 {offsets = [0, 32], sizes = [16, 32], strides = [1, 1]} : vector<16x160xf32> to vector<16x32xf32>
    %16 = arith.maximumf %14, %15 : vector<16x32xf32>
    %17 = vector.extract_strided_slice %13 {offsets = [0, 64], sizes = [16, 32], strides = [1, 1]} : vector<16x160xf32> to vector<16x32xf32>
    %18 = vector.extract_strided_slice %13 {offsets = [0, 96], sizes = [16, 32], strides = [1, 1]} : vector<16x160xf32> to vector<16x32xf32>
    %19 = arith.maximumf %17, %18 : vector<16x32xf32>
    %20 = tpu.concatenate %16, %19 in 1 : vector<16x32xf32>, vector<16x32xf32> -> vector<16x64xf32>
    %c0_10 = arith.constant 0 : index
    %c0_11 = arith.constant 0 : index
    %21 = vector.load %arg6[%c0_10, %c0_11] : memref<16x64xf32, #tpu.memory_space<vmem>>, vector<16x64xf32>
    tpu.vector_store %arg6[%c0_10, %c0_11], %20 {strides = array<i32>} : memref<16x64xf32, #tpu.memory_space<vmem>>, vector<16x64xf32>,
    return
  }
  func.func @transform_0(%arg0: i32) -> (i32, i32) {
    %c0_i32 = arith.constant 0 : i32
    %c0_i32_0 = arith.constant 0 : i32
    return %arg0, %c0_i32 : i32, i32
  }
  func.func @transform_1(%arg0: i32) -> (i32, i32) {
    %c0_i32 = arith.constant 0 : i32
    %c0_i32_0 = arith.constant 0 : i32
    %c0_i32_1 = arith.constant 0 : i32
    return %c0_i32, %c0_i32_0 : i32, i32
  }
  func.func @transform_2(%arg0: i32) -> (i32, i32) {
    %c0_i32 = arith.constant 0 : i32
    %c0_i32_0 = arith.constant 0 : i32
    %c0_i32_1 = arith.constant 0 : i32
    return %c0_i32, %c0_i32_0 : i32, i32
  }
  func.func @transform_3(%arg0: i32) -> (i32, i32) {
    %c0_i32 = arith.constant 0 : i32
    %c0_i32_0 = arith.constant 0 : i32
    %c0_i32_1 = arith.constant 0 : i32
    return %c0_i32, %c0_i32_0 : i32, i32
  }
  func.func @transform_4(%arg0: i32) -> (i32, i32) {
    %c0_i32 = arith.constant 0 : i32
    %c0_i32_0 = arith.constant 0 : i32
    %c0_i32_1 = arith.constant 0 : i32
    return %c0_i32, %c0_i32_0 : i32, i32
  }
  func.func @transform_5(%arg0: i32) -> (i32, i32) {
    %c0_i32 = arith.constant 0 : i32
    %c0_i32_0 = arith.constant 0 : i32
    return %arg0, %c0_i32 : i32, i32
  }
}

</mosaic_0001>

<bundles_post_ra>
// kernel: tpu_custom_call.1
= control target key start
LH: loop header
LB: loop body
LE: loop exit
PB: predicated region body
PF: predicated region fallthrough
CT: control target
= control target key end

     0   :  { %10 = vsyncpa [#allocation3], 0  ;;  %s1439_s0 = inlined_call_operand.vmem [shape: f32[20,128], index: 0, kind: input, shape index: {}]   ;;  %s1440_s1 = inlined_call_operand.vmem [shape: f32[128,448], index: 1, kind: input, shape index: {}]   ;;  %s1441_s2 = inlined_call_operand.vmem [shape: f32[1,448], index: 2, kind: input, shape index: {}]   ;;  %s1442_s3 = inlined_call_operand.vmem [shape: f32[416,160], index: 3, kind: input, shape index: {}]   ;;  %s1443_s4 = inlined_call_operand.vmem [shape: f32[1,160], index: 4, kind: input, shape index: {}]   ;;  %s1444_s5 = inlined_call_operand.hbm [shape: f32[20,64], index: 5, kind: output, shape index: {}]  }
   0x1   :  { %12 = vsyncpa [#allocation3 + $0x1], 0  ;;  %s912_s18 = smov 0   ;;  %s914_s19 = smov 0  }
   0x2   :  { %s916_s20 = smov 0   ;;  %s918_s21 = smov 0  }
   0x3 LB: > { %s933_s22 = sadd.s32 4294967295, %s876_s21   ;;  %s728_s23 = sadd.s32 4294967294, %s876_s21   ;;  %s876_s21 = sphi %s918_s21, %s1451_s21   ;;  %s872_s20 = sphi %s916_s20, %s1450_s20   ;;  %s868_s19 = sphi %s914_s19, %s1449_s19   ;;  %s864_s18 = sphi %s912_s18, %s1448_s18  }
   0x4   : > { %s937_s24 = sadd.s32 1, %s876_s21   ;;  %s135_s25 = sadd.s32 1, %s872_s20 }
   0x5   : > { %s132_s26 = ssub.s32 %s876_s21, %s937_s24  ;;  %p145_p0 = scmp.ne.s32.totalorder %s872_s20, %s868_s19 }
   0x6   : > { %p133_p1 = scmp.eq.s32.totalorder %s132_s26, 0  ;;  %p146_p2 = scmp.eq.s32.totalorder %s933_s22, 1 }
   0x7   : > { %p151_p3 = scmp.ne.s32.totalorder %s868_s19, %s864_s18  ;;  %p152_p4 = scmp.eq.s32.totalorder %s728_s23, 1 }
   0x8   : > { %s948_s27 = scalar_select %p133_p1, %s872_s20, %s135_s25  }
   0x9   : > { %p950_p5 = por %p146_p2, %p145_p0  ;;  %p954_p6 = por %p152_p4, %p151_p3 }
   0xa   : > { %p731_p7 = scmp.ge.s32.totalorder %s876_s21, 1  ;;  %p199_p8 = scmp.lt.s32.totalorder %s876_s21, 3 }
   0xc   : > { %p200_p9 = pnand %p731_p7, %p199_p8 }
   0xd   : > { %s1042_s11 = sshll.u32 (!%p200_p9), %s933_s22, 1  ;;  %s228_s15 = sand.u32 (!%p200_p9), 1, %s868_s19  }
   0xe   : > { %203 = sbr.rel (%p200_p9) target bundleno = 699 (0x2bb), region = 40  ;;  %p236_p10 = scmp.lt.s32.totalorder (!%p200_p9), %s1042_s11, 2 }
   0xf   : > { %s732_s16 = sshll.u32 (!%p200_p9), %s228_s15, 4  ;;  %s1379_s23 = scalar_lea.sflag (!%p200_p9), [#allocation3], %s228_s15 }
  0x10   : > { %s230_s17 = scalar_lea.vmem (!%p200_p9), [#allocation2], %s732_s16 }
  0x13   : > { %v312_v0 = vld [vmem:[%s1440_s1 + $0x1e0] sm:$0xff]  ;;  %v313_v1 = vld [vmem:[%s1440_s1 + $0x1e8] sm:$0xff]  ;;  %v314_v2 = vld [vmem:[%s1440_s1 + $0x1f0] sm:$0xff]  ;;  %s1090_s9 = scalar_select %p236_p10, %s1042_s11, 2  ;;  %vm442_vm0 = vcmask 785408   ;;  %vm521_vm1 = vcmask 261120  }
  0x14   : > { %326 = vmatpush.msra.mxu0 %v312_v0  ;;  %349 = vmatpush.msra.mxu1 %v313_v1  ;;  %v308_v3 = vld [vmem:[%s1440_s1 + $0x1c0] sm:$0xff]  ;;  %v309_v4 = vld [vmem:[%s1440_s1 + $0x1c8] sm:$0xff]  ;;  %v310_v5 = vld [vmem:[%s1440_s1 + $0x1d0] sm:$0xff]  ;;  %vm640_vm2 = vcmask 523264   ;;  %s652_s25 = ssub.s32 (%p950_p5), 3, %s1042_s11 }
  0x15   : > { %372 = vmatpush.msra.mxu2 %v314_v2  ;;  %v304_v6 = vld [vmem:[%s1440_s1 + $0x1a0] sm:$0xff]  ;;  %v305_v7 = vld [vmem:[%s1440_s1 + $0x1a8] sm:$0xff]  ;;  %v306_v8 = vld [vmem:[%s1440_s1 + $0x1b0] sm:$0xff]  ;;  %s734_s13 = sshll.u32 %s1090_s9, 3  ;;  %p653_p11 = scmp.lt.s32.totalorder (%p950_p5), %s652_s25, 2 }
  0x16   : > { %327 = vmatpush.msra.mxu0 %v308_v3  ;;  %350 = vmatpush.msra.mxu1 %v309_v4  ;;  %v300_v9 = vld [vmem:[%s1440_s1 + $0x180] sm:$0xff]  ;;  %v301_v10 = vld [vmem:[%s1440_s1 + $0x188] sm:$0xff]  ;;  %v302_v11 = vld [vmem:[%s1440_s1 + $0x190] sm:$0xff]  ;;  %s239_s14 = scalar_lea.vmem %s1439_s0, %s734_s13 }
  0x17   : > { %373 = vmatpush.msra.mxu2 %v310_v5  ;;  %v296_v12 = vld [vmem:[%s1440_s1 + $0x160] sm:$0xff]  ;;  %v297_v13 = vld [vmem:[%s1440_s1 + $0x168] sm:$0xff]  ;;  %v315_v14 = vld [vmem:[%s1440_s1 + $0x1f8] sm:$0xff] }
  0x18   : > { %328 = vmatpush.msra.mxu0 %v304_v6  ;;  %351 = vmatpush.msra.mxu1 %v305_v7  ;;  %v298_v15 = vld [vmem:[%s1440_s1 + $0x170] sm:$0xff]  ;;  %v311_v16 = vld [vmem:[%s1440_s1 + $0x1d8] sm:$0xff]  ;;  %v292_v17 = vld [vmem:[%s1440_s1 + $0x140] sm:$0xff] }
  0x19   : > { %374 = vmatpush.msra.mxu2 %v306_v8  ;;  %v293_v18 = vld [vmem:[%s1440_s1 + $0x148] sm:$0xff]  ;;  %395 = vmatpush.msra.mxu3 %v315_v14  ;;  %v294_v19 = vld [vmem:[%s1440_s1 + $0x150] sm:$0xff]  ;;  %v307_v20 = vld [vmem:[%s1440_s1 + $0x1b8] sm:$0xff] }
  0x1a   : > { %329 = vmatpush.msra.mxu0 %v300_v9  ;;  %352 = vmatpush.msra.mxu1 %v301_v10  ;;  %v288_v21 = vld [vmem:[%s1440_s1 + $0x120] sm:$0xff]  ;;  %v289_v22 = vld [vmem:[%s1440_s1 + $0x128] sm:$0xff]  ;;  %v290_v23 = vld [vmem:[%s1440_s1 + $0x130] sm:$0xff] }
  0x1b   : > { %375 = vmatpush.msra.mxu2 %v302_v11  ;;  %396 = vmatpush.msra.mxu3 %v311_v16  ;;  %v303_v24 = vld [vmem:[%s1440_s1 + $0x198] sm:$0xff]  ;;  %v284_v25 = vld [vmem:[%s1440_s1 + $0x100] sm:$0xff]  ;;  %v285_v26 = vld [vmem:[%s1440_s1 + $0x108] sm:$0xff] }
  0x1c   : > { %330 = vmatpush.msra.mxu0 %v296_v12  ;;  %353 = vmatpush.msra.mxu1 %v297_v13  ;;  %v286_v27 = vld [vmem:[%s1440_s1 + $0x110] sm:$0xff]  ;;  %v299_v28 = vld [vmem:[%s1440_s1 + $0x178] sm:$0xff]  ;;  %v280_v29 = vld [vmem:[%s1440_s1 + $0xe0] sm:$0xff] }
  0x1d   : > { %376 = vmatpush.msra.mxu2 %v298_v15  ;;  %397 = vmatpush.msra.mxu3 %v307_v20  ;;  %v281_v30 = vld [vmem:[%s1440_s1 + $0xe8] sm:$0xff]  ;;  %v282_v31 = vld [vmem:[%s1440_s1 + $0xf0] sm:$0xff]  ;;  %v295_v32 = vld [vmem:[%s1440_s1 + $0x158] sm:$0xff] }
  0x1e   : > { %331 = vmatpush.msra.mxu0 %v292_v17  ;;  %354 = vmatpush.msra.mxu1 %v293_v18  ;;  %v276_v33 = vld [vmem:[%s1440_s1 + $0xc0] sm:$0xff]  ;;  %v277_v34 = vld [vmem:[%s1440_s1 + $0xc8] sm:$0xff]  ;;  %v278_v35 = vld [vmem:[%s1440_s1 + $0xd0] sm:$0xff] }
  0x1f   : > { %377 = vmatpush.msra.mxu2 %v294_v19  ;;  %398 = vmatpush.msra.mxu3 %v303_v24  ;;  %v291_v36 = vld [vmem:[%s1440_s1 + $0x138] sm:$0xff]  ;;  %v272_v37 = vld [vmem:[%s1440_s1 + $0xa0] sm:$0xff]  ;;  %v273_v38 = vld [vmem:[%s1440_s1 + $0xa8] sm:$0xff] }
  0x20   : > { %332 = vmatpush.msra.mxu0 %v288_v21  ;;  %355 = vmatpush.msra.mxu1 %v289_v22  ;;  %v274_v39 = vld [vmem:[%s1440_s1 + $0xb0] sm:$0xff]  ;;  %v287_v40 = vld [vmem:[%s1440_s1 + $0x118] sm:$0xff]  ;;  %v268_v41 = vld [vmem:[%s1440_s1 + $0x80] sm:$0xff] }
  0x21   : > { %378 = vmatpush.msra.mxu2 %v290_v23  ;;  %399 = vmatpush.msra.mxu3 %v299_v28  ;;  %v269_v42 = vld [vmem:[%s1440_s1 + $0x88] sm:$0xff]  ;;  %v270_v43 = vld [vmem:[%s1440_s1 + $0x90] sm:$0xff]  ;;  %v283_v44 = vld [vmem:[%s1440_s1 + $0xf8] sm:$0xff] }
  0x22   : > { %333 = vmatpush.msra.mxu0 %v284_v25  ;;  %356 = vmatpush.msra.mxu1 %v285_v26  ;;  %v264_v45 = vld [vmem:[%s1440_s1 + $0x60] sm:$0xff]  ;;  %v265_v46 = vld [vmem:[%s1440_s1 + $0x68] sm:$0xff]  ;;  %v266_v47 = vld [vmem:[%s1440_s1 + $0x70] sm:$0xff] }
  0x23   : > { %379 = vmatpush.msra.mxu2 %v286_v27  ;;  %400 = vmatpush.msra.mxu3 %v295_v32  ;;  %v279_v48 = vld [vmem:[%s1440_s1 + $0xd8] sm:$0xff]  ;;  %v260_v49 = vld [vmem:[%s1440_s1 + $0x40] sm:$0xff]  ;;  %v261_v50 = vld [vmem:[%s1440_s1 + $0x48] sm:$0xff] }
  0x24   : > { %334 = vmatpush.msra.mxu0 %v280_v29  ;;  %357 = vmatpush.msra.mxu1 %v281_v30  ;;  %v262_v51 = vld [vmem:[%s1440_s1 + $0x50] sm:$0xff]  ;;  %v275_v52 = vld [vmem:[%s1440_s1 + $0xb8] sm:$0xff]  ;;  %v256_v53 = vld [vmem:[%s1440_s1 + $0x20] sm:$0xff] }
  0x25   : > { %380 = vmatpush.msra.mxu2 %v282_v31  ;;  %401 = vmatpush.msra.mxu3 %v291_v36  ;;  %v257_v54 = vld [vmem:[%s1440_s1 + $0x28] sm:$0xff]  ;;  %v258_v55 = vld [vmem:[%s1440_s1 + $0x30] sm:$0xff]  ;;  %v271_v56 = vld [vmem:[%s1440_s1 + $0x98] sm:$0xff] }
  0x26   : > { %335 = vmatpush.msra.mxu0 %v276_v33  ;;  %358 = vmatpush.msra.mxu1 %v277_v34  ;;  %v252_v57 = vld [vmem:[%s1440_s1] sm:$0xff]  ;;  %v253_v58 = vld [vmem:[%s1440_s1 + $0x8] sm:$0xff]  ;;  %v254_v59 = vld [vmem:[%s1440_s1 + $0x10] sm:$0xff] }
  0x27   : > { %381 = vmatpush.msra.mxu2 %v278_v35  ;;  %402 = vmatpush.msra.mxu3 %v287_v40  ;;  %v250_v60 = vld [vmem:[%s239_s14] sm:$0xff]  ;;  %v267_v61 = vld [vmem:[%s1440_s1 + $0x78] sm:$0xff]  ;;  %v251_v0 = vld [vmem:[%s239_s14 + $0x8] sm:$0xff]  ;;  %s878_s14 = smov 96  }
  0x28   : > { %336 = vmatpush.msra.mxu0 %v272_v37  ;;  %359 = vmatpush.msra.mxu1 %v273_v38  ;;  %v263_v62 = vld [vmem:[%s1440_s1 + $0x58] sm:$0xff]  ;;  %v316_v2 = vld [vmem:[%s1441_s2] sm:$0xf]  ;;  %v512_v26 = vld [vmem:[%s1442_s3 + $0x2f0] sm:$0xff] }
  0x29   : > { %382 = vmatpush.msra.mxu2 %v274_v39  ;;  %403 = vmatpush.msra.mxu3 %v283_v44  ;;  %v259_v63 = vld [vmem:[%s1440_s1 + $0x38] sm:$0xff]  ;;  %v318_v5 = vperm.slane %v316_v2, 0  ;;  %v320_v6 = vperm.slane %v316_v2, 2  ;;  %v319_v8 = vperm.slane %v316_v2, 1  ;;  %v321_v17 = vperm.slane %v316_v2, 3  ;;  %v480_v27 = vld [vmem:[%s1442_s3 + $0xf0] sm:$0xff] }
  0x2a   : > { %337 = vmatpush.msra.mxu0 %v268_v41  ;;  %360 = vmatpush.msra.mxu1 %v269_v42  ;;  %v255_v1 = vld [vmem:[%s1440_s1 + $0x18] sm:$0xff]  ;;  %v496_v28 = vld [vmem:[%s1442_s3 + $0x1f0] sm:$0xff]  ;;  %v511_v29 = vld [vmem:[%s1442_s3 + $0x2e0] sm:$0xff] }
  0x2b   : > { %383 = vmatpush.msra.mxu2 %v270_v43  ;;  %404 = vmatpush.msra.mxu3 %v279_v48  ;;  %v479_v30 = vld [vmem:[%s1442_s3 + $0xe0] sm:$0xff]  ;;  %v510_v32 = vld [vmem:[%s1442_s3 + $0x2d0] sm:$0xff] }
  0x2c   : > { %338 = vmatpush.msra.mxu0 %v264_v45  ;;  %361 = vmatpush.msra.mxu1 %v265_v46  ;;  %v495_v31 = vld [vmem:[%s1442_s3 + $0x1e0] sm:$0xff]  ;;  %v478_v33 = vld [vmem:[%s1442_s3 + $0xd0] sm:$0xff] }
  0x2d   : > { %384 = vmatpush.msra.mxu2 %v266_v47  ;;  %405 = vmatpush.msra.mxu3 %v275_v52  ;;  %v494_v34 = vld [vmem:[%s1442_s3 + $0x1d0] sm:$0xff]  ;;  %v509_v35 = vld [vmem:[%s1442_s3 + $0x2c0] sm:$0xff] }
  0x2e   : > { %339 = vmatpush.msra.mxu0 %v260_v49  ;;  %362 = vmatpush.msra.mxu1 %v261_v50  ;;  %v477_v36 = vld [vmem:[%s1442_s3 + $0xc0] sm:$0xff]  ;;  %v508_v38 = vld [vmem:[%s1442_s3 + $0x2b0] sm:$0xff] }
  0x2f   : > { %385 = vmatpush.msra.mxu2 %v262_v51  ;;  %406 = vmatpush.msra.mxu3 %v271_v56  ;;  %v493_v37 = vld [vmem:[%s1442_s3 + $0x1c0] sm:$0xff]  ;;  %v476_v39 = vld [vmem:[%s1442_s3 + $0xb0] sm:$0xff] }
  0x30   : > { %340 = vmatpush.msra.mxu0 %v256_v53  ;;  %363 = vmatpush.msra.mxu1 %v257_v54  ;;  %v492_v40 = vld [vmem:[%s1442_s3 + $0x1b0] sm:$0xff]  ;;  %v507_v41 = vld [vmem:[%s1442_s3 + $0x2a0] sm:$0xff] }
  0x31   : > { %386 = vmatpush.msra.mxu2 %v258_v55  ;;  %407 = vmatpush.msra.mxu3 %v267_v61  ;;  %v475_v42 = vld [vmem:[%s1442_s3 + $0xa0] sm:$0xff]  ;;  %v516_v43 = vld [vmem:[%s1442_s3 + $0x330] sm:$0xff] }
  0x32   : > { %341 = vmatpush.msra.mxu0 %v252_v57  ;;  %364 = vmatpush.msra.mxu1 %v253_v58  ;;  %v491_v44 = vld [vmem:[%s1442_s3 + $0x1a0] sm:$0xff]  ;;  %v506_v45 = vld [vmem:[%s1442_s3 + $0x290] sm:$0xff] }
  0x33   : > { %387 = vmatpush.msra.mxu2 %v254_v59  ;;  %342 = vmatmul.f32.vlgmr.msra.gmra.mxu0 %v250_v60  ;;  %v474_v46 = vld [vmem:[%s1442_s3 + $0x90] sm:$0xff]  ;;  %v505_v48 = vld [vmem:[%s1442_s3 + $0x280] sm:$0xff] }
  0x34   : > { %365 = vmatmul.f32.vlgmr.msra.gmra.mxu1 %v250_v60  ;;  %388 = vmatmul.f32.vlgmr.msra.gmra.mxu2 %v250_v60  ;;  %v490_v47 = vld [vmem:[%s1442_s3 + $0x190] sm:$0xff]  ;;  %v473_v49 = vld [vmem:[%s1442_s3 + $0x80] sm:$0xff] }
  0x35   : > { %408 = vmatpush.msra.mxu3 %v263_v62  ;;  %574 = vmatpush.msrb.mxu2 %v512_v26  ;;  %v489_v50 = vld [vmem:[%s1442_s3 + $0x180] sm:$0xff]  ;;  %v504_v51 = vld [vmem:[%s1442_s3 + $0x270] sm:$0xff] }
  0x36   : > { %528 = vmatpush.msrb.mxu0 %v480_v27  ;;  %551 = vmatpush.msrb.mxu1 %v496_v28  ;;  %v472_v52 = vld [vmem:[%s1442_s3 + $0x70] sm:$0xff]  ;;  %v503_v54 = vld [vmem:[%s1442_s3 + $0x260] sm:$0xff] }
  0x37   : > { %409 = vmatpush.msra.mxu3 %v259_v63  ;;  %575 = vmatpush.msrb.mxu2 %v511_v29  ;;  %v488_v53 = vld [vmem:[%s1442_s3 + $0x170] sm:$0xff]  ;;  %v471_v55 = vld [vmem:[%s1442_s3 + $0x60] sm:$0xff] }
  0x38   : > { %529 = vmatpush.msrb.mxu0 %v479_v30  ;;  %552 = vmatpush.msrb.mxu1 %v495_v31  ;;  %v487_v56 = vld [vmem:[%s1442_s3 + $0x160] sm:$0xff]  ;;  %v502_v57 = vld [vmem:[%s1442_s3 + $0x250] sm:$0xff] }
  0x39   : > { %410 = vmatpush.msra.mxu3 %v255_v1  ;;  %576 = vmatpush.msrb.mxu2 %v510_v32  ;;  %v515_v58 = vld [vmem:[%s1442_s3 + $0x320] sm:$0xff]  ;;  %v470_v59 = vld [vmem:[%s1442_s3 + $0x50] sm:$0xff] }
  0x3a   : > { %411 = vmatmul.f32.vlgmr.msra.gmra.mxu3 %v250_v60  ;;  %530 = vmatpush.msrb.mxu0 %v478_v33  ;;  %v486_v60 = vld [vmem:[%s1442_s3 + $0x150] sm:$0xff]  ;;  %v501_v61 = vld [vmem:[%s1442_s3 + $0x240] sm:$0xff] }
  0x3b   : > { %345 = vmatmul.f32.gmra.mxu0 %v251_v0  ;;  %553 = vmatpush.msrb.mxu1 %v494_v34  ;;  %v469_v62 = vld [vmem:[%s1442_s3 + $0x40] sm:$0xff]  ;;  %v514_v1 = vld [vmem:[%s1442_s3 + $0x310] sm:$0xff] }
  0x3c   : > { %368 = vmatmul.f32.gmra.mxu1 %v251_v0  ;;  %391 = vmatmul.f32.gmra.mxu2 %v251_v0  ;;  %v485_v63 = vld [vmem:[%s1442_s3 + $0x140] sm:$0xff]  ;;  %v468_v2 = vld [vmem:[%s1442_s3 + $0x30] sm:$0xff] }
  0x3d   : > { %577 = vmatpush.msrb.mxu2 %v509_v35  ;;  %531 = vmatpush.msrb.mxu0 %v477_v36 }
  0x3e   : > { %554 = vmatpush.msrb.mxu1 %v493_v37  ;;  %609 = vmatpush.msrb.mxu3 %v516_v43  ;;  %v517_v43 = vld [vmem:[%s1443_s4] sm:$0x3] }
  0x3f   : > { %578 = vmatpush.msrb.mxu2 %v508_v38  ;;  %532 = vmatpush.msrb.mxu0 %v476_v39 }
  0x40   : > { %555 = vmatpush.msrb.mxu1 %v492_v40  ;;  %610 = vmatpush.msrb.mxu3 %v515_v58 }
  0x41   : > { %579 = vmatpush.msrb.mxu2 %v507_v41  ;;  %533 = vmatpush.msrb.mxu0 %v475_v42 }
  0x42   : > { %414 = vmatmul.f32.gmra.mxu3 %v251_v0  ;;  %556 = vmatpush.msrb.mxu1 %v491_v44  ;;  %v500_v0 = vld [vmem:[%s1442_s3 + $0x230] sm:$0xff] }
  0x43   : > { %580 = vmatpush.msrb.mxu2 %v506_v45  ;;  %534 = vmatpush.msrb.mxu0 %v474_v46 }
  0x44   : > { %557 = vmatpush.msrb.mxu1 %v490_v47  ;;  %611 = vmatpush.msrb.mxu3 %v514_v1 }
  0x45   : > { %581 = vmatpush.msrb.mxu2 %v505_v48  ;;  %535 = vmatpush.msrb.mxu0 %v473_v49 }
  0x46   : > { %558 = vmatpush.msrb.mxu1 %v489_v50 }
  0x47   : > { %582 = vmatpush.msrb.mxu2 %v504_v51  ;;  %536 = vmatpush.msrb.mxu0 %v472_v52 }
  0x48   : > { %559 = vmatpush.msrb.mxu1 %v488_v53 }
  0x49   : > { %583 = vmatpush.msrb.mxu2 %v503_v54  ;;  %537 = vmatpush.msrb.mxu0 %v471_v55 }
  0x4a   : > { %560 = vmatpush.msrb.mxu1 %v487_v56 }
  0x4b   : > { %584 = vmatpush.msrb.mxu2 %v502_v57  ;;  %538 = vmatpush.msrb.mxu0 %v470_v59 }
  0x4c   : > { %561 = vmatpush.msrb.mxu1 %v486_v60 }
  0x4d   : > { %585 = vmatpush.msrb.mxu2 %v501_v61  ;;  %539 = vmatpush.msrb.mxu0 %v469_v62 }
  0x4e   : > { %562 = vmatpush.msrb.mxu1 %v485_v63 }
  0x4f   : > { %586 = vmatpush.msrb.mxu2 %v500_v0  ;;  %540 = vmatpush.msrb.mxu0 %v468_v2 }
  0xb0   : > { %v343_v3 = vpop.f32.mrf.mxu0 }
  0xb1   : > { %v366_v4 = vpop.f32.mrf.mxu1  ;;  %v1168_v7 = vadd.f32 %v343_v3, %v318_v5  ;;  %v484_v3 = vld [vmem:[%s1442_s3 + $0x130] sm:$0xff] }
  0xb2   : > { %v1181_v18 = vadd.f32 %v366_v4, %v319_v8  ;;  %v499_v4 = vld [vmem:[%s1442_s3 + $0x220] sm:$0xff]  ;;  %563 = vmatpush.msrb.mxu1 %v484_v3 }
  0xb3   : > { %587 = vmatpush.msrb.mxu2 %v499_v4 }
  0xb7   : > { %v389_v9 = vpop.f32.mrf.mxu2 }
  0xb8   : > { %v1170_v10 = vadd.f32 %v389_v9, %v320_v6  ;;  %v346_v11 = vpop.f32.mrf.mxu0  ;;  %v513_v9 = vld [vmem:[%s1442_s3 + $0x300] sm:$0xff] }
  0xb9   : > { %v1172_v12 = vadd.f32 %v346_v11, %v318_v5  ;;  %v369_v13 = vpop.f32.mrf.mxu1  ;;  %v467_v5 = vld [vmem:[%s1442_s3 + $0x20] sm:$0xff]  ;;  %612 = vmatpush.msrb.mxu3 %v513_v9  ;;  %v466_v11 = vld [vmem:[%s1442_s3 + $0x10] sm:$0xff] }
  0xba   : > { %v1174_v14 = vadd.f32 %v369_v13, %v319_v8  ;;  %v788_v15 = vpack.i.bf16 %v1168_v7, %v1170_v10  ;;  %v498_v8 = vld [vmem:[%s1442_s3 + $0x210] sm:$0xff]  ;;  %541 = vmatpush.msrb.mxu0 %v467_v5 }
  0xbb   : > { %588 = vmatpush.msrb.mxu2 %v498_v8  ;;  %v482_v13 = vld [vmem:[%s1442_s3 + $0x110] sm:$0xff] }
  0xbc   : > { %789 = vrot.lane.b32.xlu0 %v788_v15, %s878_s14  ;;  %v798_v16 = vpack.i.bf16 %v1174_v14, %v1172_v12  ;;  %v497_v15 = vld [vmem:[%s1442_s3 + $0x200] sm:$0xff]  ;;  %542 = vmatpush.msrb.mxu0 %v466_v11 }
  0xbd   : > { %v412_v21 = vpop.f32.mrf.mxu3  ;;  %589 = vmatpush.msrb.mxu2 %v497_v15 }
  0xbe   : > { %799 = vrot.lane.b32.xlu2 %v798_v16, %s878_s14  ;;  %v1186_v22 = vadd.f32 %v412_v21, %v321_v17  ;;  %v465_v16 = vld [vmem:[%s1442_s3] sm:$0xff] }
  0xbf   : > { %v392_v19 = vpop.f32.mrf.mxu2  ;;  %543 = vmatpush.msrb.mxu0 %v465_v16 }
  0xc0   : > { %v1184_v20 = vadd.f32 %v392_v19, %v320_v6  ;;  %v483_v6 = vld [vmem:[%s1442_s3 + $0x120] sm:$0xff] }
  0xc1   : > { %564 = vmatpush.msrb.mxu1 %v483_v6 }
  0xc2   : > { %v793_v23 = vpack.i.bf16 %v1184_v20, %v1181_v18 }
  0xc3   : > { %565 = vmatpush.msrb.mxu1 %v482_v13 }
  0xc4   : > { %794 = vrot.lane.b32.xlu1 %v793_v23, %s878_s14  ;;  %432 = vrot.lane.b32.xlu0 %v1186_v22, %s878_s14 }
  0xc5   : > { %v415_v24 = vpop.f32.mrf.mxu3 }
  0xc6   : > { %v1193_v25 = vadd.f32 %v415_v24, %v321_v17  ;;  %v481_v17 = vld [vmem:[%s1442_s3 + $0x100] sm:$0xff] }
  0xc7   : > { %566 = vmatpush.msrb.mxu1 %v481_v17 }
  0xcc   : > { %440 = vrot.lane.b32.xlu1 %v1193_v25, %s878_s14 }
 0x118   : > { %v800_v30 = vpop.permute.xlu2 %799 }
 0x119   : > { %v802_v36 = vunpack.i.h.bf16 %v800_v30  ;;  %v801_v37 = vunpack.i.l.bf16 %v800_v30 }
 0x11b   : > { %v446_v40 = vsel %vm442_vm0, %v801_v37, %v802_v36 }
 0x12e   : > { %v790_v19 = vpop.permute.xlu0 %789 }
 0x12f   : > { %v791_v21 = vunpack.i.l.bf16 %v790_v19  ;;  %v792_v26 = vunpack.i.h.bf16 %v790_v19 }
 0x136   : > { %v795_v23 = vpop.permute.xlu1 %794  ;;  %v433_v24 = vpop.permute.xlu0 %432 }
 0x137   : > { %v796_v27 = vunpack.i.l.bf16 %v795_v23  ;;  %v445_v28 = vsel %vm442_vm0, %v791_v21, %v433_v24  ;;  %v460_v29 = vmax.f32 %v1186_v22, %v433_v24  ;;  %v797_v38 = vunpack.i.h.bf16 %v795_v23 }
 0x138   : > { %v459_v31 = vmax.f32 %v1170_v10, %v445_v28 }
 0x139   : > { %735 = vmatmul.msk.f32.vlgmr.msrb.gmra.mxu3 %vm521_vm1, %v460_v29  ;;  %v443_v32 = vsel %vm442_vm0, %v792_v26, %v796_v27  ;;  %v444_v33 = vsel %vm442_vm0, %v796_v27, %v791_v21  ;;  %v447_v41 = vsel %vm442_vm0, %v802_v36, %v797_v38 }
 0x13a   : > { %590 = vmatmul.f32.vlgmr.msrb.gmra.mxu2 %v459_v31  ;;  %v457_v34 = vmax.f32 %v1168_v7, %v443_v32  ;;  %v458_v35 = vmax.f32 %v1181_v18, %v444_v33  ;;  %v461_v7 = vmax.f32 %v1172_v12, %v446_v40  ;;  %v462_v18 = vmax.f32 %v1174_v14, %v447_v41 }
 0x13c   : > { %544 = vmatmul.f32.vlgmr.msrb.gmra.mxu0 %v457_v34  ;;  %567 = vmatmul.f32.vlgmr.msrb.gmra.mxu1 %v458_v35 }
 0x13e   : > { %v441_v22 = vpop.permute.xlu1 %440 }
 0x13f   : > { %v448_v39 = vsel %vm442_vm0, %v797_v38, %v441_v22  ;;  %v464_v10 = vmax.f32 %v1193_v25, %v441_v22  ;;  %v519_v25 = vperm.slane %v517_v43, 0 }
 0x140   : > { %v463_v42 = vmax.f32 %v1184_v20, %v448_v39 }
 0x141   : > { %736 = vmatmul.msk.f32.gmra.mxu3 %vm521_vm1, %v464_v10 }
 0x142   : > { %593 = vmatmul.f32.gmra.mxu2 %v463_v42 }
 0x144   : > { %547 = vmatmul.f32.gmra.mxu0 %v461_v7  ;;  %570 = vmatmul.f32.gmra.mxu1 %v462_v18 }
 0x1b9   : > { %v545_v44 = vpop.f32.mrf.mxu0  ;;  %v568_v45 = vpop.f32.mrf.mxu1 }
 0x1ba   : > { %v546_v46 = vadd.f32 %v545_v44, %v519_v25 }
 0x1bc   : > { %v569_v47 = vadd.f32 %v568_v45, %v546_v46  ;;  %v614_v20 = vpop.f32.mrf.mxu3 }
 0x1bd   : > { %v591_v48 = vpop.f32.mrf.mxu2 }
 0x1be   : > { %v592_v49 = vadd.f32 %v591_v48, %v569_v47 }
 0x1c0   : > { %v615_v50 = vadd.f32 %v614_v20, %v592_v49 }
 0x1c1   : > { %v548_v51 = vpop.f32.mrf.mxu0  ;;  %v571_v14 = vpop.f32.mrf.mxu1 }
 0x1c2   : > { %v549_v12 = vadd.f32 %v548_v51, %v519_v25  ;;  %622 = vrot.lane.b32.xlu2 %v615_v50, %s878_s14 }
 0x1c4   : > { %v572_v52 = vadd.f32 %v571_v14, %v549_v12  ;;  %v617_v55 = vpop.f32.mrf.mxu3 }
 0x1c5   : > { %v594_v53 = vpop.f32.mrf.mxu2 }
 0x1c6   : > { %v595_v54 = vadd.f32 %v594_v53, %v572_v52 }
 0x1c8   : > { %v618_v56 = vadd.f32 %v617_v55, %v595_v54 }
 0x1ca   : > { %624 = vrot.lane.b32.xlu0 %v618_v56, %s878_s14 }
 0x21c   : > { %v623_v57 = vpop.permute.xlu2 %622 }
 0x21d   : > { %v628_v58 = vmax.f32 %v615_v50, %v623_v57 }
 0x21f   : > { %632 = vrot.lane.b32.xlu1 %v628_v58, %s878_s14 }
 0x23c   : > { %v625_v59 = vpop.permute.xlu0 %624 }
 0x23d   : > { %v629_v60 = vmax.f32 %v618_v56, %v625_v59 }
 0x23f   : > { %634 = vrot.lane.b32.xlu2 %v629_v60, %s878_s14 }
 0x291   : > { %v633_v61 = vpop.permute.xlu1 %632 }
 0x292   : > { %v638_v62 = vsel %vm521_vm1, %v628_v58, %v633_v61 }
 0x293   : > { %641 = vst.msk [vmem:[%s230_s17] sm:$0xff] %vm640_vm2, %v638_v62 }
 0x297   : > { %650 = sbr.rel (!%p950_p5) target bundleno = 699 (0x2bb), region = 44 }
 0x299   : > { %v635_v63 = vpop.permute.xlu2 %634 }
 0x29a   : > { %v639_v0 = vsel %vm521_vm1, %v629_v60, %v635_v63 }
 0x29b   : > { %642 = vst.msk [vmem:[%s230_s17 + $0x8] sm:$0xff] %vm640_vm2, %v639_v0 }
 0x29c   : > { %s1453_s25 = smov (!%p653_p11, %s652_s25), 2 }
 0x29d   : > { %s739_s14 = sshll.u32 %s1453_s25, 3 }
 0x29e   : > { %s656_s26 = ssub.s32 16, %s739_s14 }
 0x29f   : > { %s657_s30 = sshll.u32 %s656_s26, 4 }
 0x2a0   : > { %658 = vsyncadd %s1379_s23, %s657_s30  ;;  %p1388_p12 = scmp.ne.s32.totalorder %s739_s14, 0  ;;  %s746_s28 = sshll.u32 %s933_s22, 4 }
 0x2a1   : > { %s661_s11 = scalar_lea.hbm %s1444_s5, %s746_s28  ;;  %s663_s7 = sshll.u32 %s230_s17, 4  ;;  %s1396_s7 = int_to_ptr.vmem [resolvable:$true] %s663_s7 }
 0x2a2   : > { %s665_s8 = sshll.u32 %s661_s11, 4  ;;  %s743_s10 = sshll.u32 %s1453_s25, 7  ;;  %s1398_s8 = int_to_ptr.hbm [resolvable:$true] %s665_s8 }
 0x2a3   : > { %s803_s12 = sshra.s32 %s1396_s7, 4  ;;  %s805_s15 = sshrl.u32 %s743_s10, 4  ;;  %s804_s12 = int_to_ptr.vmem [resolvable:$true] %s803_s12 }
 0x2a4   : > { %s810_s16 = scalar_lea.vmem %s804_s12, %s805_s15  ;;  %s879_s22 = smov [#allocation2]  }
 0x2a5   : > { %p811_p13 = scmp.ne.s32.totalorder %s804_s12, %s810_s16  ;;  %s814_s14 = scalar_lea.vmem %s879_s22, 32 }
 0x2a6   : > { %p816_p2 = scmp.lt.s32.totalorder %s814_s14, %s810_s16 }
 0x2a7   : > { %p812_p0 = pnand %p811_p13, %p1388_p12 }
 0x2a9   : > { %p813_p1 = pneg %p812_p0 }
 0x2ab   : > { %p818_p3 = pnand %p816_p2, %p813_p1 }
 0x2ad   : > { %821 = shalt.err (!%p818_p3)
}
 0x2ae   : > { %s822_s17 = sshra.s32 %s1398_s8, 4  ;;  %s833_s13 = scalar_lea.hbm %s1444_s5, 24  ;;  %s823_s17 = int_to_ptr.hbm [resolvable:$true] %s822_s17 }
 0x2af   : > { %s829_s26 = scalar_lea.hbm %s823_s17, %s805_s15  ;;  %p834_p8 = scmp.lt.s32.totalorder %s823_s17, %s1444_s5 }
 0x2b0   : > { %p830_p4 = scmp.ne.s32.totalorder %s823_s17, %s829_s26  ;;  %p835_p9 = scmp.lt.s32.totalorder %s833_s13, %s829_s26 }
 0x2b2   : > { %p831_p5 = pnand %p830_p4, %p1388_p12  ;;  %p836_p10 = por %p835_p9, %p834_p8 }
 0x2b4   : > { %p832_p7 = pneg %p831_p5 }
 0x2b6   : > { %p837_p11 = pnand %p836_p10, %p832_p7 }
 0x2b8   : > { %840 = shalt.err (!%p837_p11)
}
 0x2b9   : > { %s880_s12 = smov 128   ;;  %s881_s15 = smov 8  }
 0x2ba   : > { %671 = dma.vmem_to_hbm [thread:$0]  (%p1388_p12), %s1396_s7, %s743_s10, %s1398_s8, %s1379_s23, %s880_s12, %s880_s12, %s881_s15  }
 0x2bb PF: > { %p752_p13 = scmp.ge.s32.totalorder %s876_s21, 2  ;;  %s680_s16 = sand.u32 1, %s864_s18  }
 0x2bc   : > { %s681_s22 = scalar_lea.sflag [#allocation3], %s680_s16 }
 0x2bd   : > { %p749_p0 = pnand %p752_p13, %p954_p6 }
 0x2bf   : > { %p750_p1 = pneg %p749_p0 }
 0x2c1   : > { %859 = dma.done.wait (%p750_p1), %s681_s22, 256  }
 0x2c2   : > { %861 = vsyncadd (%p750_p1), %s681_s22, 4294967040  ;;  %p15_p2 = scmp.ge.s32.totalorder %s937_s24, 4   ;;  %s1448_s18 = smov %s868_s19 }
 0x2c3   : > { %s1449_s19 = smov %s872_s20  ;;  %s1450_s20 = smov %s948_s27 }
 0x2c4   : > { %s1451_s21 = smov %s937_s24  ;;  %17 = sbr.rel (!%p15_p2) target bundleno = 3 (0x3), region = 75 }
 0x2c9   :  { %687 = vsyncpa [#allocation3], 1 }
 0x2ca   :  { %689 = vsyncpa [#allocation3 + $0x1], 1 }

</bundles_post_ra>
